<compile_context>
chip_gen: v7x
topology: tpu7x:2x2x1
jax: 0.10.0
libtpu: 0.0.40
codegen_flags: <defaults>
</compile_context>

<pallas_src>
import functools

import jax
import jax.numpy as jnp
from jax.experimental import pallas as pl
from jax.experimental.pallas import tpu as pltpu


def _round_up(x, m):
    return ((x + m - 1) // m) * m


def _conv1d_softmax_kernel(xc_ref, xh_ref, w_ref, b_ref, o_ref, *, approx_recip):
    # xc_ref: (Cin, TL)       current L tile of the zero-padded input (NCL, L on lanes)
    # xh_ref: (Cin, 128)      right halo chunk (next 128 lanes of the padded input)
    # w_ref : (K, Cout, Cin)  conv weights, tap-major
    # b_ref : (Cout, 1)       bias (f32)
    # o_ref : (Cout, TL)      output tile; softmax is over the Cout (sublane) axis
    tl = o_ref.shape[-1]
    k_taps = w_ref.shape[0]

    # Window for this tile: TL + 128 lanes >= TL + (K - 1).
    xw = jnp.concatenate([xc_ref[...], xh_ref[...]], axis=-1)        # (Cin, TL + 128)

    # Conv as K shifted (Cout, Cin) @ (Cin, TL) MXU matmuls, f32 accumulation kept in vregs.
    # The static lane-offset slices lower to XLU lane rotates, which overlap with MXU pushes.
    # NOTE: for very small Cin an im2col (Cout, K*Cin)@(K*Cin, TL) single matmul would raise
    # MXU utilization further, but at such channel counts this op is HBM-bound anyway.
    acc = jnp.zeros((o_ref.shape[0], tl), jnp.float32)
    for k in range(k_taps):                                          # K is small & static
        tap = xw[:, k:k + tl]                                        # (Cin, TL)
        acc = acc + jnp.dot(w_ref[k], tap, preferred_element_type=jnp.float32)

    acc = acc + b_ref[...]                                           # (Cout,1) lane-broadcast

    # Numerically-stable softmax over the channel (sublane) axis, all in f32.
    m = jnp.max(acc, axis=0, keepdims=True)
    e = jnp.exp(acc - m)
    s = jnp.sum(e, axis=0, keepdims=True)
    inv = pl.reciprocal(s, approx=approx_recip)                      # EUP slot
    o_ref[...] = (e * inv).astype(o_ref.dtype)


def lastconv1x1_forward(x, weight, bias, *, stride=1, padding=3, tile_l=512,
                        compute_dtype=None, approx_reciprocal=True,
                        vmem_limit_bytes=48 * 1024 * 1024):
    """Conv1d(Cin->Cout, K, stride=1, padding) + softmax(dim=1).

    x: (N, Cin, L); weight: (Cout, Cin, K); bias: (Cout,). Returns (N, Cout, L_out) in NCL.
    """
    if stride != 1:
        raise NotImplementedError("only stride=1 (the module default) is supported")
    N, Cin, L = x.shape
    Cout, Cin_w, K = weight.shape
    assert Cin_w == Cin and bias.shape == (Cout,)
    assert K - 1 <= 128, "halo chunk only covers up to 128 extra taps"

    L_out = L + 2 * padding - (K - 1)
    # L tile: multiple of 128 (lane-dense stores), capped so per-step VMEM stays well under the
    # v7x 64 MiB budget while keeping enough pipeline depth.
    TL = min(_round_up(tile_l, 128), _round_up(L_out, 128))
    nT = pl.cdiv(L_out, TL)
    Lx = nT * TL + 128                    # conv pad + tile/halo alignment round-up
    chunks_per_tile = TL // 128

    cdt = jnp.dtype(compute_dtype) if compute_dtype is not None else x.dtype
    # Zero-pad once (left = conv padding, right = conv padding + alignment); stays in NCL.
    x_ext = jnp.pad(x.astype(cdt), ((0, 0), (0, 0), (padding, Lx - padding - L)))
    w_k = jnp.transpose(weight, (2, 0, 1)).astype(cdt)               # (K, Cout, Cin)
    b2 = bias.reshape(Cout, 1).astype(jnp.float32)

    kernel = functools.partial(_conv1d_softmax_kernel, approx_recip=approx_reciprocal)

    cost = pl.CostEstimate(
        flops=2 * N * nT * TL * K * Cin * Cout,
        transcendentals=N * nT * TL * Cout,
        bytes_accessed=(x_ext.size * x_ext.dtype.itemsize
                        + w_k.size * w_k.dtype.itemsize
                        + N * Cout * nT * TL * x.dtype.itemsize),
    )

    out = pl.pallas_call(
        kernel,
        out_shape=jax.ShapeDtypeStruct((N, Cout, nT * TL), x.dtype),
        grid=(N, nT),
        in_specs=[
            # current L tile (no halo, plain blocked index map)
            pl.BlockSpec((None, Cin, TL), lambda n, j: (n, 0, j)),
            # right halo: the next 128-lane chunk of the padded input (same array, 2nd operand)
            pl.BlockSpec((None, Cin, 128),
                         lambda n, j: (n, 0, (j + 1) * chunks_per_tile)),
            # weights / bias: constant index maps -> stay resident in VMEM across the grid
            pl.BlockSpec((K, Cout, Cin), lambda n, j: (0, 0, 0)),
            pl.BlockSpec((Cout, 1), lambda n, j: (0, 0)),
        ],
        out_specs=pl.BlockSpec((None, Cout, TL), lambda n, j: (n, 0, j)),
        compiler_params=pltpu.CompilerParams(
            dimension_semantics=("parallel", "parallel"),
            vmem_limit_bytes=vmem_limit_bytes,
        ),
        cost_estimate=cost,
    )(x_ext, x_ext, w_k, b2)

    return out[:, :, :L_out]


def _reference(x, weight, bias, padding):
    y = jax.lax.conv_general_dilated(
        x, weight, window_strides=(1,), padding=[(padding, padding)],
        dimension_numbers=("NCH", "OIH", "NCH"))
    y = y + bias[None, :, None]
    return jax.nn.softmax(y, axis=1)


if __name__ == "__main__":
    N, Cin, Cout, K, PAD = 2, 4, 8, 7, 3
    key = jax.random.PRNGKey(0)
    k_a, k_b = jax.random.split(key)

    def make_inputs(k, L):
        kx, kw, kb = jax.random.split(k, 3)
        bound = 1.0 / (Cin * K) ** 0.5     # PyTorch-style uniform init bound
        x = jax.random.normal(kx, (N, Cin, L), dtype=jnp.float32)
        w = jax.random.uniform(kw, (Cout, Cin, K), jnp.float32, -bound, bound)
        b = jax.random.uniform(kb, (Cout,), jnp.float32, -bound, bound)
        return x, w, b

    # 1) small shape, single L tile, f32 + exact reciprocal -> tight tolerance
    x1, w1, b1 = make_inputs(k_a, 16)
    out1 = jax.block_until_ready(
        lastconv1x1_forward(x1, w1, b1, padding=PAD, approx_reciprocal=False))
    ref1 = _reference(x1, w1, b1, PAD)
    assert out1.shape == ref1.shape
    assert jnp.allclose(out1, ref1, atol=1e-5, rtol=1e-5)

    # 2) multi-tile L (halo crosses L-tile boundaries), f32 + exact reciprocal
    x2, w2, b2 = make_inputs(k_b, 300)
    out2 = jax.block_until_ready(
        lastconv1x1_forward(x2, w2, b2, padding=PAD, tile_l=128, approx_reciprocal=False))
    ref2 = _reference(x2, w2, b2, PAD)
    assert out2.shape == ref2.shape
    assert jnp.allclose(out2, ref2, atol=1e-5, rtol=1e-5)

    # 3) bf16 matmul inputs + approx reciprocal (v6e/v7x fast path); f32 accumulation keeps
    #    the softmax outputs within a few 1e-3 of the f32 reference.
    out3 = jax.block_until_ready(
        lastconv1x1_forward(x2, w2, b2, padding=PAD, tile_l=128,
                            compute_dtype=jnp.bfloat16, approx_reciprocal=True))
    assert jnp.allclose(out3, ref2, atol=3e-2, rtol=3e-2)

    print("KERNEL_OK")
</pallas_src>

<mosaic_0001>
module attributes {stable_mosaic.version = 11 : i64} {
  func.func @_conv1d_softmax_kernel(%arg0: i32, %arg1: i32, %arg2: memref<1x4x128xf32, #tpu.memory_space<vmem>>, %arg3: memref<1x4x128xf32, #tpu.memory_space<vmem>>, %arg4: memref<7x8x4xf32, #tpu.memory_space<vmem>>, %arg5: memref<8x1xf32, #tpu.memory_space<vmem>>, %arg6: memref<1x8x128xf32, #tpu.memory_space<vmem>>) attributes {dimension_semantics = [#tpu.dimension_semantics<parallel>, #tpu.dimension_semantics<parallel>], iteration_bounds = array<i64: 2, 1>, scalar_prefetch = 0 : i64, scratch_operands = 0 : i64, tpu.core_type = #tpu.core_type<tc>, window_params = [{transform_indices = @transform_0, window_bounds = array<i64: 1, 4, 128>}, {transform_indices = @transform_1, window_bounds = array<i64: 1, 4, 128>}, {pipeline_mode = #tpu.pipeline_mode<synchronous>, transform_indices = @transform_2, window_bounds = array<i64: 7, 8, 4>}, {pipeline_mode = #tpu.pipeline_mode<synchronous>, transform_indices = @transform_3, window_bounds = array<i64: 8, 1>}, {transform_indices = @transform_4, window_bounds = array<i64: 1, 8, 128>}]} {
    %c0 = arith.constant 0 : index
    %c0_0 = arith.constant 0 : index
    %c0_1 = arith.constant 0 : index
    %0 = vector.load %arg2[%c0, %c0_0, %c0_1] : memref<1x4x128xf32, #tpu.memory_space<vmem>>, vector<1x4x128xf32>
    %1 = vector.shape_cast %0 : vector<1x4x128xf32> to vector<4x128xf32>
    %c0_2 = arith.constant 0 : index
    %c0_3 = arith.constant 0 : index
    %c0_4 = arith.constant 0 : index
    %2 = vector.load %arg3[%c0_2, %c0_3, %c0_4] : memref<1x4x128xf32, #tpu.memory_space<vmem>>, vector<1x4x128xf32>
    %3 = vector.shape_cast %2 : vector<1x4x128xf32> to vector<4x128xf32>
    %4 = tpu.concatenate %1, %3 in 1 : vector<4x128xf32>, vector<4x128xf32> -> vector<4x256xf32>
    %cst = arith.constant 0.000000e+00 : f32
    %5 = vector.broadcast %cst : f32 to vector<8x128xf32>
    %6 = vector.extract_strided_slice %4 {offsets = [0, 0], sizes = [4, 128], strides = [1, 1]} : vector<4x256xf32> to vector<4x128xf32>
    %c0_5 = arith.constant 0 : index
    %c0_6 = arith.constant 0 : index
    %c0_7 = arith.constant 0 : index
    %7 = vector.load %arg4[%c0_5, %c0_6, %c0_7] : memref<7x8x4xf32, #tpu.memory_space<vmem>>, vector<1x8x4xf32>
    %8 = vector.shape_cast %7 : vector<1x8x4xf32> to vector<8x4xf32>
    %cst_8 = arith.constant dense<0.000000e+00> : vector<8x128xf32>
    %9 = tpu.matmul %8, %6, %cst_8 {dimension_numbers = #tpu.dot_dimension_numbers<[1], [0], [0], [1], [0, 0, 1, 1], [], []>} : vector<8x4xf32>, vector<4x128xf32>, vector<8x128xf32> -> vector<8x128xf32>
    %10 = arith.addf %5, %9 : vector<8x128xf32>
    %11 = vector.extract_strided_slice %4 {offsets = [0, 1], sizes = [4, 128], strides = [1, 1]} : vector<4x256xf32> to vector<4x128xf32>
    %c1 = arith.constant 1 : index
    %c0_9 = arith.constant 0 : index
    %c0_10 = arith.constant 0 : index
    %12 = vector.load %arg4[%c1, %c0_9, %c0_10] : memref<7x8x4xf32, #tpu.memory_space<vmem>>, vector<1x8x4xf32>
    %13 = vector.shape_cast %12 : vector<1x8x4xf32> to vector<8x4xf32>
    %cst_11 = arith.constant dense<0.000000e+00> : vector<8x128xf32>
    %14 = tpu.matmul %13, %11, %cst_11 {dimension_numbers = #tpu.dot_dimension_numbers<[1], [0], [0], [1], [0, 0, 1, 1], [], []>} : vector<8x4xf32>, vector<4x128xf32>, vector<8x128xf32> -> vector<8x128xf32>
    %15 = arith.addf %10, %14 : vector<8x128xf32>
    %16 = vector.extract_strided_slice %4 {offsets = [0, 2], sizes = [4, 128], strides = [1, 1]} : vector<4x256xf32> to vector<4x128xf32>
    %c2 = arith.constant 2 : index
    %c0_12 = arith.constant 0 : index
    %c0_13 = arith.constant 0 : index
    %17 = vector.load %arg4[%c2, %c0_12, %c0_13] : memref<7x8x4xf32, #tpu.memory_space<vmem>>, vector<1x8x4xf32>
    %18 = vector.shape_cast %17 : vector<1x8x4xf32> to vector<8x4xf32>
    %cst_14 = arith.constant dense<0.000000e+00> : vector<8x128xf32>
    %19 = tpu.matmul %18, %16, %cst_14 {dimension_numbers = #tpu.dot_dimension_numbers<[1], [0], [0], [1], [0, 0, 1, 1], [], []>} : vector<8x4xf32>, vector<4x128xf32>, vector<8x128xf32> -> vector<8x128xf32>
    %20 = arith.addf %15, %19 : vector<8x128xf32>
    %21 = vector.extract_strided_slice %4 {offsets = [0, 3], sizes = [4, 128], strides = [1, 1]} : vector<4x256xf32> to vector<4x128xf32>
    %c3 = arith.constant 3 : index
    %c0_15 = arith.constant 0 : index
    %c0_16 = arith.constant 0 : index
    %22 = vector.load %arg4[%c3, %c0_15, %c0_16] : memref<7x8x4xf32, #tpu.memory_space<vmem>>, vector<1x8x4xf32>
    %23 = vector.shape_cast %22 : vector<1x8x4xf32> to vector<8x4xf32>
    %cst_17 = arith.constant dense<0.000000e+00> : vector<8x128xf32>
    %24 = tpu.matmul %23, %21, %cst_17 {dimension_numbers = #tpu.dot_dimension_numbers<[1], [0], [0], [1], [0, 0, 1, 1], [], []>} : vector<8x4xf32>, vector<4x128xf32>, vector<8x128xf32> -> vector<8x128xf32>
    %25 = arith.addf %20, %24 : vector<8x128xf32>
    %26 = vector.extract_strided_slice %4 {offsets = [0, 4], sizes = [4, 128], strides = [1, 1]} : vector<4x256xf32> to vector<4x128xf32>
    %c4 = arith.constant 4 : index
    %c0_18 = arith.constant 0 : index
    %c0_19 = arith.constant 0 : index
    %27 = vector.load %arg4[%c4, %c0_18, %c0_19] : memref<7x8x4xf32, #tpu.memory_space<vmem>>, vector<1x8x4xf32>
    %28 = vector.shape_cast %27 : vector<1x8x4xf32> to vector<8x4xf32>
    %cst_20 = arith.constant dense<0.000000e+00> : vector<8x128xf32>
    %29 = tpu.matmul %28, %26, %cst_20 {dimension_numbers = #tpu.dot_dimension_numbers<[1], [0], [0], [1], [0, 0, 1, 1], [], []>} : vector<8x4xf32>, vector<4x128xf32>, vector<8x128xf32> -> vector<8x128xf32>
    %30 = arith.addf %25, %29 : vector<8x128xf32>
    %31 = vector.extract_strided_slice %4 {offsets = [0, 5], sizes = [4, 128], strides = [1, 1]} : vector<4x256xf32> to vector<4x128xf32>
    %c5 = arith.constant 5 : index
    %c0_21 = arith.constant 0 : index
    %c0_22 = arith.constant 0 : index
    %32 = vector.load %arg4[%c5, %c0_21, %c0_22] : memref<7x8x4xf32, #tpu.memory_space<vmem>>, vector<1x8x4xf32>
    %33 = vector.shape_cast %32 : vector<1x8x4xf32> to vector<8x4xf32>
    %cst_23 = arith.constant dense<0.000000e+00> : vector<8x128xf32>
    %34 = tpu.matmul %33, %31, %cst_23 {dimension_numbers = #tpu.dot_dimension_numbers<[1], [0], [0], [1], [0, 0, 1, 1], [], []>} : vector<8x4xf32>, vector<4x128xf32>, vector<8x128xf32> -> vector<8x128xf32>
    %35 = arith.addf %30, %34 : vector<8x128xf32>
    %36 = vector.extract_strided_slice %4 {offsets = [0, 6], sizes = [4, 128], strides = [1, 1]} : vector<4x256xf32> to vector<4x128xf32>
    %c6 = arith.constant 6 : index
    %c0_24 = arith.constant 0 : index
    %c0_25 = arith.constant 0 : index
    %37 = vector.load %arg4[%c6, %c0_24, %c0_25] : memref<7x8x4xf32, #tpu.memory_space<vmem>>, vector<1x8x4xf32>
    %38 = vector.shape_cast %37 : vector<1x8x4xf32> to vector<8x4xf32>
    %cst_26 = arith.constant dense<0.000000e+00> : vector<8x128xf32>
    %39 = tpu.matmul %38, %36, %cst_26 {dimension_numbers = #tpu.dot_dimension_numbers<[1], [0], [0], [1], [0, 0, 1, 1], [], []>} : vector<8x4xf32>, vector<4x128xf32>, vector<8x128xf32> -> vector<8x128xf32>
    %40 = arith.addf %35, %39 : vector<8x128xf32>
    %c0_27 = arith.constant 0 : index
    %c0_28 = arith.constant 0 : index
    %41 = vector.load %arg5[%c0_27, %c0_28] : memref<8x1xf32, #tpu.memory_space<vmem>>, vector<8x1xf32>
    %42 = vector.broadcast %41 : vector<8x1xf32> to vector<8x128xf32>
    %43 = arith.addf %40, %42 : vector<8x128xf32>
    %cst_29 = arith.constant dense<0xFF800000> : vector<128xf32>
    %44 = vector.multi_reduction <maximumf>, %43, %cst_29 [0] : vector<8x128xf32> to vector<128xf32>
    %45 = vector.shape_cast %44 : vector<128xf32> to vector<1x128xf32>
    %46 = vector.broadcast %45 : vector<1x128xf32> to vector<8x128xf32>
    %47 = arith.subf %43, %46 : vector<8x128xf32>
    %48 = math.exp %47 : vector<8x128xf32>
    %cst_30 = arith.constant dense<0.000000e+00> : vector<128xf32>
    %49 = vector.multi_reduction <add>, %48, %cst_30 [0] : vector<8x128xf32> to vector<128xf32>
    %50 = vector.shape_cast %49 : vector<128xf32> to vector<1x128xf32>
    %51 = tpu.reciprocal %50 : vector<1x128xf32> -> vector<1x128xf32>
    %52 = vector.broadcast %51 : vector<1x128xf32> to vector<8x128xf32>
    %53 = arith.mulf %48, %52 : vector<8x128xf32>
    %c0_31 = arith.constant 0 : index
    %c0_32 = arith.constant 0 : index
    %c0_33 = arith.constant 0 : index
    %54 = vector.load %arg6[%c0_31, %c0_32, %c0_33] : memref<1x8x128xf32, #tpu.memory_space<vmem>>, vector<1x8x128xf32>
    %55 = vector.shape_cast %54 : vector<1x8x128xf32> to vector<8x128xf32>
    %56 = vector.shape_cast %53 : vector<8x128xf32> to vector<1x8x128xf32>
    tpu.vector_store %arg6[%c0_31, %c0_32, %c0_33], %56 {strides = array<i32>} : memref<1x8x128xf32, #tpu.memory_space<vmem>>, vector<1x8x128xf32>,
    return
  }
  func.func @transform_0(%arg0: i32, %arg1: i32) -> (i32, i32, i32) {
    %c0_i32 = arith.constant 0 : i32
    %c0_i32_0 = arith.constant 0 : i32
    return %arg0, %c0_i32, %arg1 : i32, i32, i32
  }
  func.func @transform_1(%arg0: i32, %arg1: i32) -> (i32, i32, i32) {
    %c1_i32 = arith.constant 1 : i32
    %0 = arith.addi %arg1, %c1_i32 : i32
    %c1_i32_0 = arith.constant 1 : i32
    %1 = arith.muli %0, %c1_i32_0 : i32
    %c0_i32 = arith.constant 0 : i32
    %c0_i32_1 = arith.constant 0 : i32
    return %arg0, %c0_i32, %1 : i32, i32, i32
  }
  func.func @transform_2(%arg0: i32, %arg1: i32) -> (i32, i32, i32) {
    %c0_i32 = arith.constant 0 : i32
    %c0_i32_0 = arith.constant 0 : i32
    %c0_i32_1 = arith.constant 0 : i32
    %c0_i32_2 = arith.constant 0 : i32
    return %c0_i32, %c0_i32_0, %c0_i32_1 : i32, i32, i32
  }
  func.func @transform_3(%arg0: i32, %arg1: i32) -> (i32, i32) {
    %c0_i32 = arith.constant 0 : i32
    %c0_i32_0 = arith.constant 0 : i32
    %c0_i32_1 = arith.constant 0 : i32
    return %c0_i32, %c0_i32_0 : i32, i32
  }
  func.func @transform_4(%arg0: i32, %arg1: i32) -> (i32, i32, i32) {
    %c0_i32 = arith.constant 0 : i32
    %c0_i32_0 = arith.constant 0 : i32
    return %arg0, %c0_i32, %arg1 : i32, i32, i32
  }
}

</mosaic_0001>

<bundles_post_ra>
// kernel: tpu_custom_call.1
= control target key start
LH: loop header
LB: loop body
LE: loop exit
PB: predicated region body
PF: predicated region fallthrough
CT: control target
= control target key end

     0   :  { %9 = vsyncpa [#allocation3], 0  ;;  %s1421_s0 = inlined_call_operand.vmem [shape: f32[2,4,256], index: 0, kind: input, shape index: {}]   ;;  %s1422_s1 = inlined_call_operand.vmem [shape: f32[2,4,256], index: 1, kind: input, shape index: {}]   ;;  %s1423_s2 = inlined_call_operand.vmem [shape: f32[7,8,4], index: 2, kind: input, shape index: {}]   ;;  %s1424_s3 = inlined_call_operand.vmem [shape: f32[8,1], index: 3, kind: input, shape index: {}]   ;;  %s1425_s4 = inlined_call_operand.hbm [shape: f32[2,8,128], index: 4, kind: output, shape index: {}]  }
   0x1   :  { %11 = vsyncpa [#allocation3 + $0x1], 0  ;;  %s1247_s15 = smov 0   ;;  %s1249_s16 = smov 0  }
   0x2   :  { %s1251_s17 = smov 0   ;;  %s1253_s18 = smov 0  }
   0x3   :  { %s1255_s19 = smov 0   ;;  %s1257_s20 = smov 0  }
   0x4 LB: > { %s976_s21 = sadd.s32 4294967295, %s1210_s20   ;;  %s977_s22 = sadd.s32 4294967294, %s1210_s20   ;;  %s1210_s20 = sphi %s1257_s20, %s17_s20   ;;  %s1206_s19 = sphi %s1255_s19, %s1432_s19   ;;  %s1202_s18 = sphi %s1253_s18, %s1431_s18   ;;  %s1198_s17 = sphi %s1251_s17, %s1430_s17   ;;  %s1194_s16 = sphi %s1249_s16, %s1429_s16   ;;  %s1190_s15 = sphi %s1247_s15, %s1428_s15  }
   0x5   : > { %s29_s23 = sadd.s32 1, %s1206_s19  ;;  %s138_s24 = sadd.s32 1, %s1198_s17 }
   0x6   : > { %p31_p0 = scmp.ge.s32.totalorder %s29_s23, 2  ;;  %p148_p1 = scmp.ne.s32.totalorder %s1198_s17, %s1194_s16 }
   0x7   : > { %p149_p2 = scmp.eq.s32.totalorder %s976_s21, 1  ;;  %p154_p3 = scmp.ne.s32.totalorder %s1194_s16, %s1190_s15 }
   0x8   : > { %s1434_s23 = smov (%p31_p0, %s29_s23), 0  ;;  %p155_p5 = scmp.eq.s32.totalorder %s977_s22, 1 }
   0x9   : > { %p1287_p4 = por %p149_p2, %p148_p1  ;;  %s133_s26 = ssub.s32 %s1206_s19, %s1434_s23 }
   0xa   : > { %p980_p6 = scmp.ge.s32.totalorder %s1210_s20, 1  ;;  %p136_p7 = scmp.eq.s32.totalorder %s133_s26, 0 }
   0xb   : > { %p1294_p8 = por %p155_p5, %p154_p3  ;;  %p203_p9 = scmp.lt.s32.totalorder %s1210_s20, 3 }
   0xc   : > { %s1300_s28 = scalar_select %p136_p7, %s1198_s17, %s138_s24  }
   0xd   : > { %p204_p10 = pnand %p980_p6, %p203_p9 }
   0xe   : > { %p241_p11 = scmp.lt.s32.totalorder (!%p204_p10), %s1202_s18, 1  ;;  %v1212_v0 = vmov (!%p204_p10), 0.0   ;;  %vm1213_vm0 = vmmov (!%p204_p10), 0   ;;  %vm276_vm1 = vcmask (!%p204_p10), 1043456   ;;  %v261_v2 = vld [vmem:[%s1423_s2] sm:$0xff] (!%p204_p10)  ;;  %vm272_vm2 = vcmask (!%p204_p10), 31744  }
   0xf   : > { %207 = sbr.rel (%p204_p10) target bundleno = 446 (0x1be), region = 36  ;;  %1033 = vmatprep.subr.mxu1 (!%p204_p10), %v1212_v0  ;;  %1028 = vmatprep.subr.mxu0 (!%p204_p10), %v1212_v0  ;;  %s1214_s14 = smov (!%p204_p10), 126   ;;  %v1217_v4 = vmov (!%p204_p10), 0   ;;  %v844_v5 = vld [vmem:[%s1424_s3] sm:$0xff] (!%p204_p10)  ;;  %vm514_vm3 = vcmask (!%p204_p10), 1022976   ;;  %vm270_vm4 = vcmask (!%p204_p10), 1039360  }
  0x10   : > { %1035 = vmatprep.mubr.msk.f32.mxu1 (!%p204_p10), %vm1213_vm0, %v1212_v0  ;;  %1030 = vmatprep.mubr.msk.f32.mxu0 (!%p204_p10), %vm1213_vm0, %v1212_v0  ;;  %s1215_s21 = smov (!%p204_p10), 127   ;;  %s1216_s22 = smov (!%p204_p10), 125   ;;  %vm430_vm5 = vcmask (!%p204_p10), 1031168   ;;  %v986_v12 = vld [vmem:[%s1423_s2 + $0x8] sm:$0xff] (!%p204_p10)  ;;  %vm598_vm6 = vcmask (!%p204_p10), 1014784   ;;  %v994_v15 = vld [vmem:[%s1423_s2 + $0x18] sm:$0xff] (!%p204_p10) }
  0x11   : > { %1127 = vset.pattern.permute.xlu0 (!%p204_p10), %v1217_v4  ;;  %s1218_s24 = smov (!%p204_p10), 124   ;;  %s1219_s26 = smov (!%p204_p10), 123   ;;  %v991_v19 = vld [vmem:[%s1423_s2 + $0x10] sm:$0xff] (!%p204_p10)  ;;  %vm682_vm7 = vcmask (!%p204_p10), 1006592   ;;  %v997_v23 = vld [vmem:[%s1423_s2 + $0x20] sm:$0xff] (!%p204_p10)  ;;  %v1000_v24 = vld [vmem:[%s1423_s2 + $0x28] sm:$0xff] (!%p204_p10) }
  0x12   : > { %vm766_vm8 = vcmask (!%p204_p10), 998400   ;;  %v1003_v28 = vld [vmem:[%s1423_s2 + $0x30] sm:$0xff] (!%p204_p10) }
  0x16   : > { %s242_s29 = scalar_select %p241_p11, %s1202_s18, 1 }
  0x18   : > { %s1010_s30 = sshll.u32 %s242_s29, 3  ;;  %s1220_s29 = smov 122  }
  0x19   : > { %s248_s7 = scalar_lea.vmem %s1421_s0, %s1010_s30  ;;  %s1012_s8 = sadd.s32 4, %s1010_s30 }
  0x1a   : > { %v259_v1 = vld [vmem:[%s248_s7] sm:$0xf]  ;;  %s257_s11 = scalar_lea.vmem %s1422_s1, %s1012_s8  ;;  %s1007_s30 = sshll.u32 %s1202_s18, 7 }
  0x1b   : > { %426 = vrot.lane.b32.xlu1 %v259_v1, %s1214_s14  ;;  %266 = vrot.lane.b32.xlu0 %v259_v1, %s1215_s21  ;;  %v260_v3 = vld [vmem:[%s257_s11] sm:$0xf]  ;;  %s1374_s9 = scalar_lea.hbm %s1425_s4, %s1007_s30  ;;  %s1221_s18 = smov [#allocation2]  }
  0x1c   : > { %1034 = vmatpush3.msk.msra.mxu1 %vm276_vm1, %v259_v1  ;;  %s1136_s12 = sshll.u32 %s1221_s18, 4  ;;  %s1137_s12 = int_to_ptr.vmem [resolvable:$false] %s1136_s12 }
  0x1d   : > { %1043 = vmatprep.subr.mxu1 %v1212_v0  ;;  %1036 = vmatmul.mubr.msk.f32.vlgmr.msra.gmra.mrb[0].mxu1 %vm272_vm2, %v261_v2  ;;  %s1138_s13 = scalar_lea.vmem %s1137_s12, 256 }
  0x1e   : > { %1045 = vmatprep.mubr.msk.f32.mxu1 %vm1213_vm0, %v1212_v0 }
  0x1f   : > { %428 = vrot.lane.b32.xlu1 %v260_v3, %s1214_s14  ;;  %510 = vrot.lane.b32.xlu0 %v259_v1, %s1216_s22 }
  0x23   : > { %512 = vrot.lane.b32.xlu1 %v260_v3, %s1216_s22  ;;  %268 = vrot.lane.b32.xlu0 %v260_v3, %s1215_s21 }
  0x27   : > { %596 = vrot.lane.b32.xlu1 %v260_v3, %s1218_s24  ;;  %594 = vrot.lane.b32.xlu0 %v259_v1, %s1218_s24 }
  0x2b   : > { %680 = vrot.lane.b32.xlu1 %v260_v3, %s1219_s26  ;;  %678 = vrot.lane.b32.xlu0 %v259_v1, %s1219_s26  ;;  %s238_s26 = sand.u32 1, %s1194_s16  }
  0x2c   : > { %s870_s10 = scalar_lea.sflag [#allocation3], %s238_s26 }
  0x2f   : > { %764 = vrot.lane.b32.xlu1 %v260_v3, %s1220_s29  ;;  %762 = vrot.lane.b32.xlu0 %v259_v1, %s1220_s29  ;;  %s981_s29 = sshll.u32 %s238_s26, 3 }
  0x30   : > { %s240_s5 = scalar_lea.vmem [#allocation2], %s981_s29 }
  0x31   : > { %s884_s6 = sshll.u32 %s240_s5, 4  ;;  %s1376_s6 = int_to_ptr.vmem [resolvable:$true] %s884_s6 }
  0x32   : > { %s1132_s11 = scalar_lea.vmem %s1376_s6, 128  ;;  %p1139_p1 = scmp.lt.s32.totalorder %s1376_s6, %s1137_s12 }
  0x33   : > { %847 = vperm.xlu0 %1127, %v844_v5   ;;  %p1133_p12 = scmp.ne.s32.totalorder %s1376_s6, %s1132_s11  ;;  %p1140_p2 = scmp.lt.s32.totalorder %s1138_s13, %s1132_s11 }
  0x35   : > { %p1134_p13 = pnand %p1133_p12, %p1287_p4  ;;  %p1141_p3 = por %p1140_p2, %p1139_p1 }
  0x37   : > { %p1135_p0 = pneg %p1134_p13 }
  0x39   : > { %p1142_p5 = pnand %p1141_p3, %p1135_p0 }
  0x8d   : > { %v427_v6 = vpop.permute.xlu1 %426  ;;  %v267_v7 = vpop.permute.xlu0 %266 }
  0x91   : > { %v429_v8 = vpop.permute.xlu1 %428  ;;  %v511_v9 = vpop.permute.xlu0 %510 }
  0x92   : > { %v431_v16 = vsel %vm430_vm5, %v427_v6, %v429_v8 }
  0x95   : > { %v513_v10 = vpop.permute.xlu1 %512  ;;  %v269_v11 = vpop.permute.xlu0 %268 }
  0x96   : > { %v515_v13 = vsel %vm514_vm3, %v511_v9, %v513_v10  ;;  %v271_v14 = vsel %vm270_vm4, %v267_v7, %v269_v11 }
  0x97   : > { %1029 = vmatpush3.msk.msra.mxu0 %vm276_vm1, %v271_v14  ;;  %1044 = vmatpush3.msk.msra.mxu1 %vm276_vm1, %v515_v13 }
  0x98   : > { %1031 = vmatmul.mubr.msk.f32.vlgmr.msra.gmra.mrb[0].mxu0 %vm272_vm2, %v986_v12  ;;  %1038 = vmatprep.subr.mxu0 %v1212_v0 }
  0x99   : > { %v597_v17 = vpop.permute.xlu1 %596  ;;  %1039 = vmatpush3.msk.msra.mxu0 %vm276_vm1, %v431_v16  ;;  %v595_v18 = vpop.permute.xlu0 %594  ;;  %1040 = vmatprep.mubr.msk.f32.mxu0 %vm1213_vm0, %v1212_v0 }
  0x9a   : > { %v599_v20 = vsel %vm598_vm6, %v595_v18, %v597_v17  ;;  %1048 = vmatprep.subr.mxu0 %v1212_v0  ;;  %1046 = vmatmul.mubr.msk.f32.vlgmr.msra.gmra.mrb[2].mxu1 %vm272_vm2, %v994_v15 }
  0x9b   : > { %1053 = vmatprep.subr.mxu1 %v1212_v0  ;;  %1055 = vmatprep.mubr.msk.f32.mxu1 %vm1213_vm0, %v1212_v0 }
  0x9c   : > { %1041 = vmatmul.mubr.msk.f32.vlgmr.msra.gmra.mrb[2].mxu0 %vm272_vm2, %v991_v19 }
  0x9d   : > { %1049 = vmatpush3.msk.msra.mxu0 %vm276_vm1, %v599_v20  ;;  %v681_v21 = vpop.permute.xlu1 %680  ;;  %v679_v22 = vpop.permute.xlu0 %678  ;;  %1050 = vmatprep.mubr.msk.f32.mxu0 %vm1213_vm0, %v1212_v0 }
  0x9e   : > { %v683_v25 = vsel %vm682_vm7, %v679_v22, %v681_v21  ;;  %1058 = vmatprep.subr.mxu0 %v1212_v0 }
  0x9f   : > { %1054 = vmatpush3.msk.msra.mxu1 %vm276_vm1, %v683_v25 }
  0xa0   : > { %1051 = vmatmul.mubr.msk.f32.vlgmr.msra.gmra.mrb[4].mxu0 %vm272_vm2, %v997_v23  ;;  %1056 = vmatmul.mubr.msk.f32.vlgmr.msra.gmra.mrb[4].mxu1 %vm272_vm2, %v1000_v24 }
  0xa1   : > { %v765_v26 = vpop.permute.xlu1 %764  ;;  %v763_v27 = vpop.permute.xlu0 %762  ;;  %1060 = vmatprep.mubr.msk.f32.mxu0 %vm1213_vm0, %v1212_v0 }
  0xa2   : > { %v767_v29 = vsel %vm766_vm8, %v763_v27, %v765_v26 }
  0xa3   : > { %1059 = vmatpush3.msk.msra.mxu0 %vm276_vm1, %v767_v29 }
  0xa4   : > { %1061 = vmatmul.mubr.msk.f32.vlgmr.msra.gmra.mrb[6].mxu0 %vm272_vm2, %v1003_v28 }
  0xb2   : > { %v848_v48 = vpop.permute.xlu0 %847 }
  0xf0   : > { %v420_v30 = vpop.f32.mrb[0].mxu1 }
  0xf1   : > { %v1037_v31 = vpop.f32.mrb[1].mxu1 }
 0x16b   : > { %v345_v32 = vpop.f32.mrb[0].mxu0 }
 0x16c   : > { %v421_v33 = vadd.f32 %v420_v30, %v345_v32  ;;  %v1032_v34 = vpop.f32.mrb[1].mxu0 }
 0x16d   : > { %v587_v35 = vpop.f32.mrb[2].mxu1 }
 0x16e   : > { %v1047_v36 = vpop.f32.mrb[3].mxu1 }
 0x16f   : > { %v503_v37 = vpop.f32.mrb[2].mxu0 }
 0x170   : > { %v507_v38 = vadd.f32 %v503_v37, %v421_v33  ;;  %v1042_v39 = vpop.f32.mrb[3].mxu0 }
 0x172   : > { %v591_v40 = vadd.f32 %v587_v35, %v507_v38 }
 0x173   : > { %v671_v41 = vpop.f32.mrb[4].mxu0  ;;  %v755_v42 = vpop.f32.mrb[4].mxu1 }
 0x174   : > { %v675_v43 = vadd.f32 %v671_v41, %v591_v40  ;;  %v1052_v44 = vpop.f32.mrb[5].mxu0  ;;  %v1057_v45 = vpop.f32.mrb[5].mxu1 }
 0x176   : > { %v759_v46 = vadd.f32 %v755_v42, %v675_v43 }
 0x177   : > { %v839_v47 = vpop.f32.mrb[6].mxu0 }
 0x178   : > { %v843_v49 = vadd.f32 %v839_v47, %v759_v46  ;;  %v1062_v50 = vpop.f32.mrb[7].mxu0 }
 0x17a   : > { %v850_v51 = vadd.f32 %v848_v48, %v843_v49 }
 0x17c   : > { %v851_v52 = vrot.slane %v850_v51, 4 }
 0x17e   : > { %v852_v53 = vmax.f32 %v850_v51, %v851_v52 }
 0x180   : > { %v853_v54 = vrot.slane %v852_v53, 2 }
 0x182   : > { %v854_v55 = vmax.f32 %v852_v53, %v853_v54 }
 0x184   : > { %v855_v56 = vrot.slane %v854_v55, 1 }
 0x186   : > { %v856_v57 = vmax.f32 %v854_v55, %v855_v56 }
 0x188   : > { %v857_v58 = vsub.f32 %v850_v51, %v856_v57 }
 0x18a   : > { %v858_v59 = vmul.f32 1.442695, %v857_v58 }
 0x18c   : > { %1128 = vpow2.f32 %v858_v59 }
 0x196   : > { %v1129_v60 = vpop.eup %1128 }
 0x197   : > { %v860_v61 = vrot.slane %v1129_v60, 4 }
 0x199   : > { %v861_v62 = vadd.f32 %v1129_v60, %v860_v61 }
 0x19b   : > { %v862_v63 = vrot.slane %v861_v62, 2 }
 0x19d   : > { %v863_v0 = vadd.f32 %v862_v63, %v861_v62 }
 0x19f   : > { %v864_v1 = vrot.slane %v863_v0, 1 }
 0x1a1   : > { %v865_v2 = vadd.f32 %v864_v1, %v863_v0 }
 0x1a3   : > { %1130 = vrcp.f32 %v865_v2 }
 0x1ad   : > { %v1131_v3 = vpop.eup %1130 }
 0x1ae   : > { %v867_v4 = vmul.f32 %v1131_v3, %v1129_v60 }
 0x1b0   : > { %868 = vst [vmem:[%s240_s5] sm:$0xff] %v867_v4 }
 0x1b1   : > { %1145 = shalt.err (!%p1142_p5)
}
 0x1b2   : > { %s1146_s14 = scalar_lea.hbm %s1374_s9, 128  ;;  %s1150_s24 = scalar_lea.hbm %s1425_s4, 256 }
 0x1b3   : > { %p1147_p6 = scmp.ne.s32.totalorder %s1374_s9, %s1146_s14  ;;  %p1151_p10 = scmp.lt.u32.totalorder %s1374_s9, %s1425_s4 }
 0x1b4   : > { %p1152_p11 = scmp.lt.u32.totalorder %s1150_s24, %s1146_s14  ;;  %p1154_p13 = scmp.lt.u32.totalorder %s1146_s14, %s1374_s9 }
 0x1b5   : > { %p1148_p7 = pnand %p1147_p6, %p1287_p4 }
 0x1b6   : > { %p1153_p12 = por %p1152_p11, %p1151_p10 }
 0x1b7   : > { %p1149_p9 = pneg %p1148_p7 }
 0x1b8   : > { %p1155_p0 = por %p1154_p13, %p1153_p12 }
 0x1ba   : > { %p1156_p1 = pnand %p1155_p0, %p1149_p9 }
 0x1bc   : > { %1159 = shalt.err (!%p1156_p1)
}
 0x1bd   : > { %1063 = dma.vmem_to_hbm [thread:$0]  (%p1287_p4), %s1376_s6, 128, %s1374_s9, %s870_s10  }
 0x1be PF: > { %p1069_p2 = scmp.ge.s32.totalorder %s1210_s20, 2  ;;  %s896_s30 = sand.u32 1, %s1190_s15  }
 0x1bf   : > { %s897_s5 = scalar_lea.sflag [#allocation3], %s896_s30 }
 0x1c0   : > { %p1066_p3 = pnand %p1069_p2, %p1294_p8 }
 0x1c2   : > { %1185 = dma.done.wait (!%p1066_p3), %s897_s5, 128  }
 0x1c3   : > { %1187 = vsyncadd (!%p1066_p3), %s897_s5, 4294967168  ;;  %s17_s20 = sadd.s32 1, %s1210_s20   ;;  %s1428_s15 = smov %s1194_s16 }
 0x1c4   : > { %p14_p5 = scmp.ge.s32.totalorder %s17_s20, 4   ;;  %s1429_s16 = smov %s1198_s17 }
 0x1c5   : > { %s1430_s17 = smov %s1300_s28  ;;  %s1431_s18 = smov %s1206_s19 }
 0x1c6   : > { %s1432_s19 = smov %s1434_s23  ;;  %16 = sbr.rel (!%p14_p5) target bundleno = 4 (0x4), region = 80 }
 0x1cd   :  { %902 = vsyncpa [#allocation3], 1 }
 0x1ce   :  { %904 = vsyncpa [#allocation3 + $0x1], 1 }

</bundles_post_ra>
